<compile_context>
chip_gen: v6e
topology: v6e:2x2x1
jax: 0.10.0
libtpu: 0.0.40
codegen_flags: <defaults>
</compile_context>

<pallas_src>
import functools

import jax
import jax.numpy as jnp
from jax import lax
from jax.experimental import pallas as pl
from jax.experimental.pallas import tpu as pltpu


_VMEM_LIMIT = 32 * 1024 * 1024          # scoped-VMEM request (safe on v5e/v6e/v7x)
_FUSE_BUDGET = 24 * 1024 * 1024         # conservative working-set budget for the fused path


def _round_up(v, m):
    return ((v + m - 1) // m) * m


def _lane_cap():
    """Lane-tile cap: larger on v7x (~3.2 TB/s HBM) to amortize per-grid-step overhead."""
    try:
        kind = jax.devices()[0].device_kind.lower()
    except Exception:
        return 2048
    return 4096 if "v7" in kind else 2048


def _channel_tile(C, cap=256):
    """Channel (sublane) tile: multiple of 8 (or full C when C < 8), capped, and split so
    C >= 16 always yields >= 2 channel blocks (keeps both v7x TensorCores busy on pass 1)."""
    if C <= 8:
        return C
    cb = min(cap, (C // 8) * 8)
    if C >= 16:
        cb = min(cb, _round_up(pl.cdiv(C, 2), 8))
    return max(cb, 8)


def _lane_tile(L, cap):
    """Lane tile: multiple of 128 (or full L when L < 128), capped.  Non-divisible L is handled
    by a cdiv grid + in-kernel masking, never by a full-dim fallback."""
    if L <= 128:
        return L
    return min(cap, (L // 128) * 128)


def _fused_channel_tile(N, C, L, itemsize):
    """Largest channel tile whose fused (N, Cb, L) working set fits the VMEM budget,
    or None if even the smallest tile does not fit (then use the two-pass path)."""
    per_elem = 4 * itemsize + 16   # in+out double-buffered + f32 temporaries (x, x-mean)
    if C <= 8:
        return C if N * C * L * per_elem <= _FUSE_BUDGET else None
    cb_max = _FUSE_BUDGET // (N * L * per_elem)
    cb_max = (cb_max // 8) * 8
    if cb_max < 8:
        return None
    cb = min(cb_max, (C // 8) * 8)
    if C >= 16:
        cb = min(cb, _round_up(pl.cdiv(C, 2), 8))   # >= 2 channel blocks for v7x megacore
    return max(cb, 8)


# ---------------------------------------------------------------------------
# Kernels
# ---------------------------------------------------------------------------

def _fused_kernel(x_ref, gamma_ref, beta_ref, o_ref, *, count, eps):
    """Single-pass batch-norm on a VMEM-resident (N, Cb, L) block.

    Uses the centered (two-step) variance — numerically safer than E[x^2] - mean^2 and free
    because the block is already resident.  Padded channel rows of the last block only produce
    output rows that Pallas drops on writeback.
    """
    x = x_ref[...].astype(jnp.float32)                                 # (N, Cb, L)
    mean = jnp.sum(x, axis=(0, 2), keepdims=True) * (1.0 / count)      # (1, Cb, 1)
    xc = x - mean
    var = jnp.sum(xc * xc, axis=(0, 2), keepdims=True) * (1.0 / count)
    scale = gamma_ref[...] * lax.rsqrt(var + eps)                      # (1, Cb, 1), EUP rsqrt
    o_ref[...] = (xc * scale + beta_ref[...]).astype(o_ref.dtype)


def _stats_kernel(x_ref, sum_ref, ssq_ref, *, L, Lb):
    """Accumulate per-channel sum and sum-of-squares across the (N, L-block) reduction axes.

    The (Cb, 1) f32 outputs stay resident across the reduction (init under pl.when).  When the
    lane tile does not divide L, the padded lanes of the edge block are masked so they cannot
    corrupt the statistics of valid channels.
    """
    li = pl.program_id(2)

    @pl.when(jnp.logical_and(pl.program_id(1) == 0, li == 0))
    def _init():
        sum_ref[...] = jnp.zeros_like(sum_ref)
        ssq_ref[...] = jnp.zeros_like(ssq_ref)

    x = x_ref[...].astype(jnp.float32)                                 # (Cb, Lb)
    if L % Lb != 0:
        lane = lax.broadcasted_iota(jnp.int32, x.shape, 1) + li * Lb
        x = jnp.where(lane < L, x, 0.0)
    sum_ref[...] += jnp.sum(x, axis=1, keepdims=True)                  # (Cb, 1)
    ssq_ref[...] += jnp.sum(x * x, axis=1, keepdims=True)


def _apply_kernel(x_ref, sum_ref, ssq_ref, gamma_ref, beta_ref, o_ref, *, count, eps):
    """Streaming normalize + affine with the finalize folded in.

    The (Cb, 1) scale/shift math is recomputed per block (a handful of VPU/EUP ops riding
    otherwise-idle slots) instead of a separate tiny XLA dispatch between the two passes.
    """
    mean = sum_ref[...] * (1.0 / count)                                # (Cb, 1) f32
    var = jnp.maximum(ssq_ref[...] * (1.0 / count) - mean * mean, 0.0)
    scale = gamma_ref[...] * lax.rsqrt(var + eps)
    shift = beta_ref[...] - mean * scale
    o_ref[...] = (x_ref[...] * scale + shift).astype(o_ref.dtype)


# ---------------------------------------------------------------------------
# Wrapper
# ---------------------------------------------------------------------------

def dsbn_forward(x, gammas, betas, domain_label, *, eps=1e-5, fuse=None):
    """x: (N, C, L). gammas/betas: (num_domains, C). domain_label: 'source'/'s' or 'target'/'t'.

    fuse=None  -> auto (fused single-pass path whenever the working set fits VMEM)
    fuse=False -> force the two-pass streaming path
    """
    if x.ndim != 3:
        raise ValueError("expected 3D input, but got {}D input".format(x.ndim))
    if domain_label in ("source", "s"):
        d = 0
    elif domain_label in ("target", "t"):
        d = 1
    else:
        raise ValueError(
            '"domain label" must be "source/s" or "target/t", but got "{}".'.format(domain_label)
        )

    N, C, L = x.shape
    itemsize = jnp.dtype(x.dtype).itemsize
    count = float(N * L)
    eps = float(eps)

    gamma = gammas[d].astype(jnp.float32)
    beta = betas[d].astype(jnp.float32)

    # ---------------- Fused single-pass path: 1 read + 1 write of x ----------------
    cb_f = _fused_channel_tile(N, C, L, itemsize)
    if fuse is None:
        fuse = cb_f is not None
    if fuse and cb_f is not None:
        nC = pl.cdiv(C, cb_f)
        x_spec = pl.BlockSpec((N, cb_f, L), lambda ci: (0, ci, 0))
        ch_spec = pl.BlockSpec((1, cb_f, 1), lambda ci: (0, ci, 0))
        return pl.pallas_call(
            functools.partial(_fused_kernel, count=count, eps=eps),
            out_shape=jax.ShapeDtypeStruct((N, C, L), x.dtype),
            grid_spec=pltpu.PrefetchScalarGridSpec(
                num_scalar_prefetch=0,
                grid=(nC,),
                in_specs=[x_spec, ch_spec, ch_spec],
                out_specs=x_spec,
            ),
            compiler_params=pltpu.CompilerParams(
                dimension_semantics=("parallel",),
                vmem_limit_bytes=_VMEM_LIMIT,
            ),
            cost_estimate=pl.CostEstimate(
                flops=6 * N * C * L,
                transcendentals=C,
                bytes_accessed=2 * N * C * L * itemsize + 2 * C * 4,
            ),
        )(x, gamma.reshape(1, C, 1), beta.reshape(1, C, 1))

    # ---------------- Two-pass streaming path: 2 reads + 1 write of x ----------------
    # TODO(synk): if workloads commonly have L < 128, a relayout to a lane-dense (C, N*L)
    #             presentation would avoid masked partial stores; not done here.
    Cb = _channel_tile(C)
    Lb = _lane_tile(L, _lane_cap())
    nC = pl.cdiv(C, Cb)
    nL = pl.cdiv(L, Lb)
    grid = (nC, N, nL)

    x_spec = pl.BlockSpec((None, Cb, Lb), lambda ci, n, li: (n, ci, li))
    ch_spec = pl.BlockSpec((Cb, 1), lambda ci, n, li: (ci, 0))

    # Pass 1: per-channel sum / sum-of-squares (single read of x).
    sum_, ssq = pl.pallas_call(
        functools.partial(_stats_kernel, L=L, Lb=Lb),
        out_shape=(
            jax.ShapeDtypeStruct((C, 1), jnp.float32),
            jax.ShapeDtypeStruct((C, 1), jnp.float32),
        ),
        grid_spec=pltpu.PrefetchScalarGridSpec(
            num_scalar_prefetch=0,
            grid=grid,
            in_specs=[x_spec],
            out_specs=[ch_spec, ch_spec],
        ),
        compiler_params=pltpu.CompilerParams(
            dimension_semantics=("parallel", "arbitrary", "arbitrary"),
            vmem_limit_bytes=_VMEM_LIMIT,
        ),
        cost_estimate=pl.CostEstimate(
            flops=3 * N * C * L,
            transcendentals=0,
            bytes_accessed=N * C * L * itemsize + 2 * C * 4,
        ),
    )(x)

    # Pass 2: streaming normalize + affine, finalize folded in (read x, write y).
    y = pl.pallas_call(
        functools.partial(_apply_kernel, count=count, eps=eps),
        out_shape=jax.ShapeDtypeStruct((N, C, L), x.dtype),
        grid_spec=pltpu.PrefetchScalarGridSpec(
            num_scalar_prefetch=0,
            grid=grid,
            in_specs=[x_spec, ch_spec, ch_spec, ch_spec, ch_spec],
            out_specs=x_spec,
        ),
        compiler_params=pltpu.CompilerParams(
            dimension_semantics=("parallel", "parallel", "parallel"),
            vmem_limit_bytes=_VMEM_LIMIT,
        ),
        cost_estimate=pl.CostEstimate(
            flops=2 * N * C * L,
            transcendentals=C,
            bytes_accessed=2 * N * C * L * itemsize + 4 * C * 4,
        ),
    )(x, sum_, ssq, gamma.reshape(C, 1), beta.reshape(C, 1))

    return y


def _reference(x, gammas, betas, d, eps=1e-5):
    mean = jnp.mean(x, axis=(0, 2), keepdims=True)
    var = jnp.mean((x - mean) ** 2, axis=(0, 2), keepdims=True)
    g = gammas[d].reshape(1, -1, 1)
    b = betas[d].reshape(1, -1, 1)
    return (x - mean) / jnp.sqrt(var + eps) * g + b


if __name__ == "__main__":
    key = jax.random.PRNGKey(0)
    k1, k2 = jax.random.split(key)
    num_domains = 2

    ok = True

    # Primary shape from the module's 3D (batch, num_features, length) contract.
    N, C, L = 2, 4, 16
    x = jax.random.normal(k1, (N, C, L), dtype=jnp.float32)
    gammas = 1.0 + 0.1 * jnp.arange(num_domains * C, dtype=jnp.float32).reshape(num_domains, C)
    betas = 0.01 * jnp.arange(num_domains * C, dtype=jnp.float32).reshape(num_domains, C)
    for dom, d in (("source", 0), ("t", 1)):
        ref = _reference(x, gammas, betas, d)
        for fuse in (True, False):           # exercise both the fused and the two-pass paths
            y = dsbn_forward(x, gammas, betas, dom, fuse=fuse)
            jax.block_until_ready(y)
            ok &= bool(jnp.allclose(y, ref, atol=1e-5, rtol=1e-5))

    # Edge shape: C not a multiple of 8, L not a multiple of 128 (exercises cdiv grid + masking).
    N2, C2, L2 = 2, 12, 200
    x2 = jax.random.normal(k2, (N2, C2, L2), dtype=jnp.float32)
    g2 = 1.0 + 0.05 * jnp.arange(num_domains * C2, dtype=jnp.float32).reshape(num_domains, C2)
    b2 = 0.02 * jnp.arange(num_domains * C2, dtype=jnp.float32).reshape(num_domains, C2)
    ref2 = _reference(x2, g2, b2, 0)
    for fuse in (True, False):
        y2 = dsbn_forward(x2, g2, b2, "source", fuse=fuse)
        jax.block_until_ready(y2)
        ok &= bool(jnp.allclose(y2, ref2, atol=1e-4, rtol=1e-4))

    assert ok
    print("KERNEL_OK")
</pallas_src>

<mosaic_0001>
module attributes {stable_mosaic.version = 11 : i64} {
  func.func @_fused_kernel(%arg0: i32, %arg1: memref<2x4x16xf32, #tpu.memory_space<vmem>>, %arg2: memref<1x4x1xf32, #tpu.memory_space<vmem>>, %arg3: memref<1x4x1xf32, #tpu.memory_space<vmem>>, %arg4: memref<2x4x16xf32, #tpu.memory_space<vmem>>) attributes {dimension_semantics = [#tpu.dimension_semantics<parallel>], iteration_bounds = array<i64: 1>, scalar_prefetch = 0 : i64, scratch_operands = 0 : i64, tpu.core_type = #tpu.core_type<tc>, window_params = [{transform_indices = @transform_0, window_bounds = array<i64: 2, 4, 16>}, {transform_indices = @transform_1, window_bounds = array<i64: 1, 4, 1>}, {transform_indices = @transform_2, window_bounds = array<i64: 1, 4, 1>}, {transform_indices = @transform_3, window_bounds = array<i64: 2, 4, 16>}]} {
    %c0 = arith.constant 0 : index
    %c0_0 = arith.constant 0 : index
    %c0_1 = arith.constant 0 : index
    %0 = vector.load %arg1[%c0, %c0_0, %c0_1] : memref<2x4x16xf32, #tpu.memory_space<vmem>>, vector<2x4x16xf32>
    %cst = arith.constant dense<0.000000e+00> : vector<4xf32>
    %1 = vector.multi_reduction <add>, %0, %cst [0, 2] : vector<2x4x16xf32> to vector<4xf32>
    %2 = vector.shape_cast %1 : vector<4xf32> to vector<1x4x1xf32>
    %cst_2 = arith.constant 3.125000e-02 : f32
    %3 = vector.broadcast %cst_2 : f32 to vector<1x4x1xf32>
    %4 = arith.mulf %2, %3 : vector<1x4x1xf32>
    %5 = vector.broadcast %4 : vector<1x4x1xf32> to vector<2x4x16xf32>
    %6 = arith.subf %0, %5 : vector<2x4x16xf32>
    %7 = arith.mulf %6, %6 : vector<2x4x16xf32>
    %cst_3 = arith.constant dense<0.000000e+00> : vector<4xf32>
    %8 = vector.multi_reduction <add>, %7, %cst_3 [0, 2] : vector<2x4x16xf32> to vector<4xf32>
    %9 = vector.shape_cast %8 : vector<4xf32> to vector<1x4x1xf32>
    %cst_4 = arith.constant 3.125000e-02 : f32
    %10 = vector.broadcast %cst_4 : f32 to vector<1x4x1xf32>
    %11 = arith.mulf %9, %10 : vector<1x4x1xf32>
    %c0_5 = arith.constant 0 : index
    %c0_6 = arith.constant 0 : index
    %c0_7 = arith.constant 0 : index
    %12 = vector.load %arg2[%c0_5, %c0_6, %c0_7] : memref<1x4x1xf32, #tpu.memory_space<vmem>>, vector<1x4x1xf32>
    %cst_8 = arith.constant 9.99999974E-6 : f32
    %13 = vector.broadcast %cst_8 : f32 to vector<1x4x1xf32>
    %14 = arith.addf %11, %13 : vector<1x4x1xf32>
    %15 = math.rsqrt %14 : vector<1x4x1xf32>
    %16 = arith.mulf %12, %15 : vector<1x4x1xf32>
    %17 = vector.broadcast %16 : vector<1x4x1xf32> to vector<2x4x16xf32>
    %18 = arith.mulf %6, %17 : vector<2x4x16xf32>
    %c0_9 = arith.constant 0 : index
    %c0_10 = arith.constant 0 : index
    %c0_11 = arith.constant 0 : index
    %19 = vector.load %arg3[%c0_9, %c0_10, %c0_11] : memref<1x4x1xf32, #tpu.memory_space<vmem>>, vector<1x4x1xf32>
    %20 = vector.broadcast %19 : vector<1x4x1xf32> to vector<2x4x16xf32>
    %21 = arith.addf %18, %20 : vector<2x4x16xf32>
    %c0_12 = arith.constant 0 : index
    %c0_13 = arith.constant 0 : index
    %c0_14 = arith.constant 0 : index
    %22 = vector.load %arg4[%c0_12, %c0_13, %c0_14] : memref<2x4x16xf32, #tpu.memory_space<vmem>>, vector<2x4x16xf32>
    tpu.vector_store %arg4[%c0_12, %c0_13, %c0_14], %21 {strides = array<i32>} : memref<2x4x16xf32, #tpu.memory_space<vmem>>, vector<2x4x16xf32>,
    return
  }
  func.func @transform_0(%arg0: i32) -> (i32, i32, i32) {
    %c0_i32 = arith.constant 0 : i32
    %c0_i32_0 = arith.constant 0 : i32
    %c0_i32_1 = arith.constant 0 : i32
    return %c0_i32, %arg0, %c0_i32_0 : i32, i32, i32
  }
  func.func @transform_1(%arg0: i32) -> (i32, i32, i32) {
    %c0_i32 = arith.constant 0 : i32
    %c0_i32_0 = arith.constant 0 : i32
    %c0_i32_1 = arith.constant 0 : i32
    return %c0_i32, %arg0, %c0_i32_0 : i32, i32, i32
  }
  func.func @transform_2(%arg0: i32) -> (i32, i32, i32) {
    %c0_i32 = arith.constant 0 : i32
    %c0_i32_0 = arith.constant 0 : i32
    %c0_i32_1 = arith.constant 0 : i32
    return %c0_i32, %arg0, %c0_i32_0 : i32, i32, i32
  }
  func.func @transform_3(%arg0: i32) -> (i32, i32, i32) {
    %c0_i32 = arith.constant 0 : i32
    %c0_i32_0 = arith.constant 0 : i32
    %c0_i32_1 = arith.constant 0 : i32
    return %c0_i32, %arg0, %c0_i32_0 : i32, i32, i32
  }
}

</mosaic_0001>

<bundles_post_ra>
// kernel: tpu_custom_call.1
= control target key start
LH: loop header
LB: loop body
LE: loop exit
PB: predicated region body
PF: predicated region fallthrough
CT: control target
= control target key end

     0   :  { %vm17_vm0 = vcmask 125952   ;;  %s146_s0 = inlined_call_operand.vmem [shape: f32[2,4,16], index: 0, kind: input, shape index: {}]   ;;  %s147_s1 = inlined_call_operand.vmem [shape: f32[1,4,1], index: 1, kind: input, shape index: {}]   ;;  %s148_s2 = inlined_call_operand.vmem [shape: f32[1,4,1], index: 2, kind: input, shape index: {}]   ;;  %s149_s3 = inlined_call_operand.hbm [shape: f32[2,4,16], index: 3, kind: output, shape index: {}]  }
   0x1   :  { %v15_v0 = vld [vmem:[%s146_s0] sm:$0xf]  ;;  %v16_v1 = vld [vmem:[%s146_s0 + $0x4] sm:$0xf] }
   0x2   :  { %v18_v2 = vsel %vm17_vm0, %v15_v0, 0.0  ;;  %v19_v3 = vsel %vm17_vm0, %v16_v1, 0.0 }
   0x3   :  { %8 = vsyncpa [#allocation3], 0  ;;  %v20_v4 = vadd.f32 %v19_v3, %v18_v2  ;;  %v101_v14 = vmov 0   ;;  %v34_v18 = vld [vmem:[%s147_s1] sm:$0xf]  ;;  %s102_s19 = smov [#allocation2]  }
   0x4   :  { %75 = vset.pattern.permute.xlu1 %v101_v14  ;;  %76 = vset.pattern.permute.xlu0 %v101_v14  ;;  %v45_v21 = vld [vmem:[%s148_s2] sm:$0xf]  ;;  %s60_s20 = sshll.u32 %s102_s19, 4  ;;  %s61_s20 = int_to_ptr.vmem [resolvable:$true] %s60_s20 }
   0x5   :  { %21 = vadd.xlane.f32.xlu0 %v20_v4  ;;  %s79_s1 = scalar_lea.vmem %s61_s20, 128  ;;  %p84_p1 = scmp.lt.s32.totalorder %s61_s20, %s61_s20 }
   0x6   :  { %p80_p0 = scmp.ne.s32.totalorder %s61_s20, %s79_s1  ;;  %p85_p2 = scmp.lt.s32.totalorder %s79_s1, %s79_s1 }
   0x8   :  { %p86_p3 = por %p85_p2, %p84_p1 }
   0xa   :  { %p87_p4 = pnand %p86_p3, %p80_p0 }
  0x8e   :  { %v22_v5 = vpop.xlane.xlu0 %21 }
  0x8f   :  { %v23_v6 = vmul.f32 0.03125, %v22_v5 }
  0x91   :  { %v24_v7 = vsub.f32 %v15_v0, %v23_v6  ;;  %v25_v8 = vsub.f32 %v16_v1, %v23_v6 }
  0x93   :  { %v26_v9 = vmul.f32 %v24_v7, %v24_v7  ;;  %v27_v10 = vmul.f32 %v25_v8, %v25_v8 }
  0x95   :  { %v28_v11 = vsel %vm17_vm0, %v26_v9, 0.0  ;;  %v29_v12 = vsel %vm17_vm0, %v27_v10, 0.0 }
  0x96   :  { %v30_v13 = vadd.f32 %v29_v12, %v28_v11 }
  0x98   :  { %31 = vadd.xlane.f32.xlu0 %v30_v13 }
 0x121   :  { %v32_v15 = vpop.xlane.xlu0 %31 }
 0x122   :  { %v33_v16 = vmul.f32 0.03125, %v32_v15 }
 0x124   :  { %v35_v17 = vadd.f32 1e-05, %v33_v16 }
 0x126   :  { %77 = vrsqrt.f32 %v35_v17 }
 0x133   :  { %v78_v19 = vpop.eup %77 }
 0x134   :  { %v37_v20 = vmul.f32 %v78_v19, %v34_v18 }
 0x136   :  { %40 = vperm.xlu1 %75, %v37_v20  }
 0x13a   :  { %48 = vperm.xlu1 %75, %v45_v21  }
 0x1b1   :  { %v41_v22 = vpop.permute.xlu1 %40 }
 0x1b2   :  { %v43_v23 = vmul.f32 %v41_v22, %v24_v7  ;;  %v44_v24 = vmul.f32 %v41_v22, %v25_v8 }
 0x1b5   :  { %v49_v25 = vpop.permute.xlu1 %48 }
 0x1b6   :  { %v51_v26 = vadd.f32 %v49_v25, %v43_v23  ;;  %v52_v27 = vadd.f32 %v49_v25, %v44_v24 }
 0x1b8   :  { %53 = vst.msk [vmem:[#allocation2] sm:$0xf] %vm17_vm0, %v51_v26  ;;  %54 = vst.msk [vmem:[#allocation2 + $0x4] sm:$0xf] %vm17_vm0, %v52_v27 }
 0x1b9   :  { %90 = shalt.err (!%p87_p4)
}
 0x1ba   :  { %s103_s2 = smov 64   ;;  %s104_s21 = smov 4  }
 0x1bb   :  { %66 = dma.vmem_to_hbm [thread:$0]  %s61_s20, 128, %s149_s3, [#allocation3], %s103_s2, %s103_s2, %s104_s21  }
 0x1bc   :  { %99 = dma.done.wait [#allocation3], 128  }
 0x1bd   :  { %100 = vsyncadd [#allocation3], 4294967168 }
 0x1be   :  { %70 = vsyncpa [#allocation3], 1 }

</bundles_post_ra>
